<compile_context>
chip_gen: v7x
topology: tpu7x:2x2x1
jax: 0.10.0
libtpu: 0.0.40
codegen_flags: <defaults>
</compile_context>

<pallas_src>
import jax
import jax.numpy as jnp
from jax.experimental import pallas as pl
from jax.experimental.pallas import tpu as pltpu

_NEG_SLOPE = 0.01   # PyTorch F.leaky_relu default
_LANE = 128


def _round_up(n, m):
    return ((n + m - 1) // m) * m


def _leaky_relu(x):
    return jnp.where(x >= 0, x, _NEG_SLOPE * x)


def _mlp_kernel(x_ref, w1_ref, b1_ref, w2_ref, b2_ref, w3_ref, b3_ref, o_ref):
    # x_ref: [bt, C] pooled features (f32).  All three GEMMs are fused; the
    # [bt,512]/[bt,256] intermediates live entirely in VMEM/vregs.
    x = x_ref[...].astype(jnp.bfloat16)

    # fc1 + LeakyReLU  (bf16 MXU, f32 accumulate, f32 epilogue)
    h = jnp.dot(x, w1_ref[...], preferred_element_type=jnp.float32)
    h = _leaky_relu(h + b1_ref[...])

    # fc2 + LeakyReLU
    h = jnp.dot(h.astype(jnp.bfloat16), w2_ref[...],
                preferred_element_type=jnp.float32)
    h = _leaky_relu(h + b2_ref[...])

    # fc3 (output padded to a full 128-lane register -> lane-dense store)
    h = jnp.dot(h.astype(jnp.bfloat16), w3_ref[...],
                preferred_element_type=jnp.float32)
    o_ref[...] = (h + b3_ref[...]).astype(o_ref.dtype)


def _pick_batch_tile(batch, batch_tile):
    bt = min(batch_tile, _round_up(batch, 8))
    # v7x has two TensorCores per chip: give the "parallel" batch axis at
    # least two grid steps whenever the batch is big enough to split.  The
    # extra grid step costs ~0.35 us on single-TC chips -> harmless.
    if batch > 16 and pl.cdiv(batch, bt) < 2:
        bt = _round_up(pl.cdiv(batch, 2), 8)
    return bt


def classifier_forward(x, w1, b1, w2, b2, w3, b3, *, batch_tile=512):
    """Fused Classifier head.

    x  : [B, C, D, H, W] feature map (NCDHW, PyTorch layout).
    wN : PyTorch nn.Linear weights, [out, in]; bN : [out].
    Returns [B, num_classes] float32 logits.
    """
    B, C, D, H, W = x.shape
    S = D * H * W
    hid1 = w1.shape[0]                  # 512
    hid2 = w2.shape[0]                  # 256
    num_classes = w3.shape[0]

    # AdaptiveAvgPool3d(1) + flatten, hoisted to XLA: one reduction over the
    # contiguous spatial axis.  x is read from HBM exactly once; no transposed
    # or padded copy of the activations is ever materialized.
    pooled = jnp.mean(x.reshape(B, C, S).astype(jnp.float32), axis=-1)  # [B,C]

    # Pre-transpose weights to [in, out]; matmul weights in bf16 (halves the
    # one-time weight DMA), biases kept in f32 for the epilogue.
    w1t = jnp.asarray(w1.T, jnp.bfloat16)                       # [C,   512]
    w2t = jnp.asarray(w2.T, jnp.bfloat16)                       # [512, 256]
    n_pad = _round_up(max(num_classes, _LANE), _LANE)
    w3t = jnp.zeros((hid2, n_pad), jnp.bfloat16).at[:, :num_classes].set(
        jnp.asarray(w3.T, jnp.bfloat16))                        # [256, n_pad]
    b1r = jnp.asarray(b1, jnp.float32).reshape(1, hid1)
    b2r = jnp.asarray(b2, jnp.float32).reshape(1, hid2)
    b3r = jnp.zeros((1, n_pad), jnp.float32).at[:, :num_classes].set(
        jnp.asarray(b3, jnp.float32))

    bt = _pick_batch_tile(B, batch_tile)
    grid = (pl.cdiv(B, bt),)

    # Advisory cost model so XLA can schedule the pooling producer / output
    # slice around the otherwise-opaque custom call.
    flops = 2 * B * (C * hid1 + hid1 * hid2 + hid2 * n_pad)
    bytes_accessed = (B * C * 4 + B * n_pad * 4
                      + 2 * (C * hid1 + hid1 * hid2 + hid2 * n_pad)
                      + 4 * (hid1 + hid2 + n_pad))
    cost = pl.CostEstimate(flops=flops, transcendentals=0,
                           bytes_accessed=bytes_accessed)

    out = pl.pallas_call(
        _mlp_kernel,
        out_shape=jax.ShapeDtypeStruct((B, n_pad), jnp.float32),
        grid=grid,
        in_specs=[
            # Pooled activations: one [bt, C] tile per grid step; a partial
            # last block is masked by Pallas (no host-side pad copy, and
            # batch rows are independent so boundary garbage never mixes in).
            pl.BlockSpec((bt, C), lambda i: (i, 0)),
            # Weights / biases: constant block index -> loaded once,
            # VMEM-resident across the whole grid.
            pl.BlockSpec((C, hid1), lambda i: (0, 0)),
            pl.BlockSpec((1, hid1), lambda i: (0, 0)),
            pl.BlockSpec((hid1, hid2), lambda i: (0, 0)),
            pl.BlockSpec((1, hid2), lambda i: (0, 0)),
            pl.BlockSpec((hid2, n_pad), lambda i: (0, 0)),
            pl.BlockSpec((1, n_pad), lambda i: (0, 0)),
        ],
        out_specs=pl.BlockSpec((bt, n_pad), lambda i: (i, 0)),
        compiler_params=pltpu.CompilerParams(
            dimension_semantics=("parallel",)),
        cost_estimate=cost,
    )(pooled, w1t, b1r, w2t, b2r, w3t, b3r)

    return out[:, :num_classes]


if __name__ == "__main__":
    # Shapes matching the swin_trans usage: hidden_states_out[4] of SwinUNETR
    # with img_size=64 is [B, 768, 2, 2, 2]; Classifier(768, 2).
    # TODO(synk): the pretrained SwinUNETR.swinViT backbone that produces this
    # feature map is not re-implemented in Pallas; only the Classifier head is.
    B, C, D, H, W = 2, 768, 2, 2, 2
    num_classes = 2

    key = jax.random.PRNGKey(0)
    k = jax.random.split(key, 7)
    x = jax.random.normal(k[0], (B, C, D, H, W), jnp.float32)
    w1 = jax.random.normal(k[1], (512, C), jnp.float32) / jnp.sqrt(float(C))
    b1 = jax.random.normal(k[2], (512,), jnp.float32) * 0.01
    w2 = jax.random.normal(k[3], (256, 512), jnp.float32) / jnp.sqrt(512.0)
    b2 = jax.random.normal(k[4], (256,), jnp.float32) * 0.01
    w3 = jax.random.normal(k[5], (num_classes, 256), jnp.float32) / jnp.sqrt(256.0)
    b3 = jax.random.normal(k[6], (num_classes,), jnp.float32) * 0.01

    out = jax.block_until_ready(
        jax.jit(classifier_forward)(x, w1, b1, w2, b2, w3, b3))

    # Pure-JAX f32 reference of the PyTorch forward.
    pooled = jnp.mean(x.reshape(B, C, -1), axis=-1)
    h = jax.nn.leaky_relu(pooled @ w1.T + b1, _NEG_SLOPE)
    h = jax.nn.leaky_relu(h @ w2.T + b2, _NEG_SLOPE)
    ref = h @ w3.T + b3

    if out.shape != (B, num_classes):
        raise AssertionError(f"bad output shape {out.shape}")
    if not jnp.allclose(out, ref, atol=5e-2, rtol=5e-2):
        raise AssertionError(
            f"mismatch vs reference: max abs diff "
            f"{float(jnp.max(jnp.abs(out - ref)))}")
    print("KERNEL_OK")
</pallas_src>

<mosaic_0001>
module attributes {stable_mosaic.version = 11 : i64} {
  func.func @_mlp_kernel(%arg0: i32, %arg1: memref<8x768xf32, #tpu.memory_space<vmem>>, %arg2: memref<768x512xbf16, #tpu.memory_space<vmem>>, %arg3: memref<1x512xf32, #tpu.memory_space<vmem>>, %arg4: memref<512x256xbf16, #tpu.memory_space<vmem>>, %arg5: memref<1x256xf32, #tpu.memory_space<vmem>>, %arg6: memref<256x128xbf16, #tpu.memory_space<vmem>>, %arg7: memref<1x128xf32, #tpu.memory_space<vmem>>, %arg8: memref<8x128xf32, #tpu.memory_space<vmem>>) attributes {dimension_semantics = [#tpu.dimension_semantics<parallel>], iteration_bounds = array<i64: 1>, scalar_prefetch = 0 : i64, scratch_operands = 0 : i64, tpu.core_type = #tpu.core_type<tc>, window_params = [{transform_indices = @transform_0, window_bounds = array<i64: 8, 768>}, {pipeline_mode = #tpu.pipeline_mode<synchronous>, transform_indices = @transform_1, window_bounds = array<i64: 768, 512>}, {pipeline_mode = #tpu.pipeline_mode<synchronous>, transform_indices = @transform_2, window_bounds = array<i64: 1, 512>}, {pipeline_mode = #tpu.pipeline_mode<synchronous>, transform_indices = @transform_3, window_bounds = array<i64: 512, 256>}, {pipeline_mode = #tpu.pipeline_mode<synchronous>, transform_indices = @transform_4, window_bounds = array<i64: 1, 256>}, {pipeline_mode = #tpu.pipeline_mode<synchronous>, transform_indices = @transform_5, window_bounds = array<i64: 256, 128>}, {pipeline_mode = #tpu.pipeline_mode<synchronous>, transform_indices = @transform_6, window_bounds = array<i64: 1, 128>}, {transform_indices = @transform_7, window_bounds = array<i64: 8, 128>}]} {
    %c0 = arith.constant 0 : index
    %c0_0 = arith.constant 0 : index
    %0 = vector.load %arg1[%c0, %c0_0] : memref<8x768xf32, #tpu.memory_space<vmem>>, vector<8x768xf32>
    %1 = arith.truncf %0 : vector<8x768xf32> to vector<8x768xbf16>
    %c0_1 = arith.constant 0 : index
    %c0_2 = arith.constant 0 : index
    %2 = vector.load %arg2[%c0_1, %c0_2] : memref<768x512xbf16, #tpu.memory_space<vmem>>, vector<768x512xbf16>
    %cst = arith.constant dense<0.000000e+00> : vector<8x512xf32>
    %3 = tpu.matmul %1, %2, %cst {dimension_numbers = #tpu.dot_dimension_numbers<[1], [0], [0], [1], [0, 0, 1, 1], [], []>} : vector<8x768xbf16>, vector<768x512xbf16>, vector<8x512xf32> -> vector<8x512xf32>
    %c0_3 = arith.constant 0 : index
    %c0_4 = arith.constant 0 : index
    %4 = vector.load %arg3[%c0_3, %c0_4] : memref<1x512xf32, #tpu.memory_space<vmem>>, vector<1x512xf32>
    %5 = vector.broadcast %4 : vector<1x512xf32> to vector<8x512xf32>
    %6 = arith.addf %3, %5 : vector<8x512xf32>
    %cst_5 = arith.constant 0.000000e+00 : f32
    %7 = vector.broadcast %cst_5 : f32 to vector<8x512xf32>
    %8 = arith.cmpf oge, %6, %7 : vector<8x512xf32>
    %cst_6 = arith.constant 0.00999999977 : f32
    %9 = vector.broadcast %cst_6 : f32 to vector<8x512xf32>
    %10 = arith.mulf %9, %6 : vector<8x512xf32>
    %11 = arith.select %8, %6, %10 : vector<8x512xi1>, vector<8x512xf32>
    %12 = arith.truncf %11 : vector<8x512xf32> to vector<8x512xbf16>
    %c0_7 = arith.constant 0 : index
    %c0_8 = arith.constant 0 : index
    %13 = vector.load %arg4[%c0_7, %c0_8] : memref<512x256xbf16, #tpu.memory_space<vmem>>, vector<512x256xbf16>
    %cst_9 = arith.constant dense<0.000000e+00> : vector<8x256xf32>
    %14 = tpu.matmul %12, %13, %cst_9 {dimension_numbers = #tpu.dot_dimension_numbers<[1], [0], [0], [1], [0, 0, 1, 1], [], []>} : vector<8x512xbf16>, vector<512x256xbf16>, vector<8x256xf32> -> vector<8x256xf32>
    %c0_10 = arith.constant 0 : index
    %c0_11 = arith.constant 0 : index
    %15 = vector.load %arg5[%c0_10, %c0_11] : memref<1x256xf32, #tpu.memory_space<vmem>>, vector<1x256xf32>
    %16 = vector.broadcast %15 : vector<1x256xf32> to vector<8x256xf32>
    %17 = arith.addf %14, %16 : vector<8x256xf32>
    %cst_12 = arith.constant 0.000000e+00 : f32
    %18 = vector.broadcast %cst_12 : f32 to vector<8x256xf32>
    %19 = arith.cmpf oge, %17, %18 : vector<8x256xf32>
    %cst_13 = arith.constant 0.00999999977 : f32
    %20 = vector.broadcast %cst_13 : f32 to vector<8x256xf32>
    %21 = arith.mulf %20, %17 : vector<8x256xf32>
    %22 = arith.select %19, %17, %21 : vector<8x256xi1>, vector<8x256xf32>
    %23 = arith.truncf %22 : vector<8x256xf32> to vector<8x256xbf16>
    %c0_14 = arith.constant 0 : index
    %c0_15 = arith.constant 0 : index
    %24 = vector.load %arg6[%c0_14, %c0_15] : memref<256x128xbf16, #tpu.memory_space<vmem>>, vector<256x128xbf16>
    %cst_16 = arith.constant dense<0.000000e+00> : vector<8x128xf32>
    %25 = tpu.matmul %23, %24, %cst_16 {dimension_numbers = #tpu.dot_dimension_numbers<[1], [0], [0], [1], [0, 0, 1, 1], [], []>} : vector<8x256xbf16>, vector<256x128xbf16>, vector<8x128xf32> -> vector<8x128xf32>
    %c0_17 = arith.constant 0 : index
    %c0_18 = arith.constant 0 : index
    %26 = vector.load %arg7[%c0_17, %c0_18] : memref<1x128xf32, #tpu.memory_space<vmem>>, vector<1x128xf32>
    %27 = vector.broadcast %26 : vector<1x128xf32> to vector<8x128xf32>
    %28 = arith.addf %25, %27 : vector<8x128xf32>
    %c0_19 = arith.constant 0 : index
    %c0_20 = arith.constant 0 : index
    %29 = vector.load %arg8[%c0_19, %c0_20] : memref<8x128xf32, #tpu.memory_space<vmem>>, vector<8x128xf32>
    tpu.vector_store %arg8[%c0_19, %c0_20], %28 {strides = array<i32>} : memref<8x128xf32, #tpu.memory_space<vmem>>, vector<8x128xf32>,
    return
  }
  func.func @transform_0(%arg0: i32) -> (i32, i32) {
    %c0_i32 = arith.constant 0 : i32
    %c0_i32_0 = arith.constant 0 : i32
    return %arg0, %c0_i32 : i32, i32
  }
  func.func @transform_1(%arg0: i32) -> (i32, i32) {
    %c0_i32 = arith.constant 0 : i32
    %c0_i32_0 = arith.constant 0 : i32
    %c0_i32_1 = arith.constant 0 : i32
    return %c0_i32, %c0_i32_0 : i32, i32
  }
  func.func @transform_2(%arg0: i32) -> (i32, i32) {
    %c0_i32 = arith.constant 0 : i32
    %c0_i32_0 = arith.constant 0 : i32
    %c0_i32_1 = arith.constant 0 : i32
    return %c0_i32, %c0_i32_0 : i32, i32
  }
  func.func @transform_3(%arg0: i32) -> (i32, i32) {
    %c0_i32 = arith.constant 0 : i32
    %c0_i32_0 = arith.constant 0 : i32
    %c0_i32_1 = arith.constant 0 : i32
    return %c0_i32, %c0_i32_0 : i32, i32
  }
  func.func @transform_4(%arg0: i32) -> (i32, i32) {
    %c0_i32 = arith.constant 0 : i32
    %c0_i32_0 = arith.constant 0 : i32
    %c0_i32_1 = arith.constant 0 : i32
    return %c0_i32, %c0_i32_0 : i32, i32
  }
  func.func @transform_5(%arg0: i32) -> (i32, i32) {
    %c0_i32 = arith.constant 0 : i32
    %c0_i32_0 = arith.constant 0 : i32
    %c0_i32_1 = arith.constant 0 : i32
    return %c0_i32, %c0_i32_0 : i32, i32
  }
  func.func @transform_6(%arg0: i32) -> (i32, i32) {
    %c0_i32 = arith.constant 0 : i32
    %c0_i32_0 = arith.constant 0 : i32
    %c0_i32_1 = arith.constant 0 : i32
    return %c0_i32, %c0_i32_0 : i32, i32
  }
  func.func @transform_7(%arg0: i32) -> (i32, i32) {
    %c0_i32 = arith.constant 0 : i32
    %c0_i32_0 = arith.constant 0 : i32
    return %arg0, %c0_i32 : i32, i32
  }
}

</mosaic_0001>

<bundles_post_ra>
// kernel: classifier_forward.1
= control target key start
LH: loop header
LB: loop body
LE: loop exit
PB: predicated region body
PF: predicated region fallthrough
CT: control target
= control target key end

     0   :  { %12 = vsyncpa [#allocation3], 0  ;;  %v2979_v38 = vmov 1983009808   ;;  %v51_v40 = vlaneseq  ;;  %s3935_s0 = inlined_call_operand.vmem [shape: f32[2,768], index: 0, kind: input, shape index: {}]   ;;  %s3936_s1 = inlined_call_operand.vmem [shape: bf16[768,512], index: 1, kind: input, shape index: {}]   ;;  %s3937_s2 = inlined_call_operand.vmem [shape: f32[1,512], index: 2, kind: input, shape index: {}]   ;;  %s3938_s3 = inlined_call_operand.vmem [shape: bf16[512,256], index: 3, kind: input, shape index: {}]   ;;  %s3939_s4 = inlined_call_operand.vmem [shape: f32[1,256], index: 4, kind: input, shape index: {}]   ;;  %s3940_s5 = inlined_call_operand.vmem [shape: bf16[256,128], index: 5, kind: input, shape index: {}]   ;;  %s3941_s6 = inlined_call_operand.vmem [shape: f32[1,128], index: 6, kind: input, shape index: {}]   ;;  %s3942_s7 = inlined_call_operand.hbm [shape: f32[2,128], index: 7, kind: output, shape index: {}]  }
   0x1   :  { %v2547_v0 = vld [vmem:[%s3936_s1 + $0x4] ss:$16 sps:$4 sm:$0xff]   ;;  %v2551_v2 = vld [vmem:[%s3936_s1] ss:$16 sps:$4 sm:$0xff]   ;;  %v49_v39 = vunpack.c.l.s4 %v2979_v38  ;;  %v2648_v58 = vld [vmem:[%s3935_s0 + $0x1c] ss:$12 sps:$4 sm:$0xff]  }
   0x2   :  { %v2549_v1 = vld [vmem:[%s3936_s1 + $0x204] ss:$16 sps:$4 sm:$0xff]   ;;  %v2552_v3 = vld [vmem:[%s3936_s1 + $0x200] ss:$16 sps:$4 sm:$0xff]   ;;  %1284 = vmatprep.subr.bf16.mxu1 %v2547_v0  ;;  %v3149_v46 = vshrl.u32 %v51_v40, 7 }
   0x3   :  { %v2553_v4 = vld [vmem:[%s3936_s1 + $0x24] ss:$16 sps:$4 sm:$0xff]   ;;  %1325 = vmatprep.subr.bf16.mxu0 %v2549_v1  ;;  %1285 = vmatpush1.bf16.msra.mxu1 %v2551_v2  ;;  %v2557_v6 = vld [vmem:[%s3936_s1 + $0x20] ss:$16 sps:$4 sm:$0xff]   ;;  %v50_v45 = vunpack.c.0.s8 %v49_v39  ;;  %v2678_v38 = vld [vmem:[%s3936_s1 + $0x8c] ss:$16 sps:$4 sm:$0xff]  }
   0x4   :  { %v2555_v5 = vld [vmem:[%s3936_s1 + $0x224] ss:$16 sps:$4 sm:$0xff]   ;;  %1326 = vmatpush1.bf16.msra.mxu0 %v2552_v3  ;;  %1286 = vmatprep.subr.bf16.mxu1 %v2553_v4  ;;  %v2558_v7 = vld [vmem:[%s3936_s1 + $0x220] ss:$16 sps:$4 sm:$0xff]   ;;  %v2676_v40 = vld [vmem:[%s3936_s1 + $0x88] ss:$16 sps:$4 sm:$0xff]  }
   0x5   :  { %1327 = vmatprep.subr.bf16.mxu0 %v2555_v5  ;;  %v2559_v8 = vld [vmem:[%s3936_s1 + $0x44] ss:$16 sps:$4 sm:$0xff]   ;;  %v2563_v10 = vld [vmem:[%s3936_s1 + $0x40] ss:$16 sps:$4 sm:$0xff]   ;;  %v3167_v52 = vsub.s32 %v50_v45, %v3149_v46 }
   0x6   :  { %v2561_v9 = vld [vmem:[%s3936_s1 + $0x244] ss:$16 sps:$4 sm:$0xff]   ;;  %v2564_v11 = vld [vmem:[%s3936_s1 + $0x240] ss:$16 sps:$4 sm:$0xff]  }
   0x7   :  { %1287 = vmatpush1.bf16.msra.mxu1 %v2557_v6  ;;  %v2565_v12 = vld [vmem:[%s3936_s1 + $0x64] ss:$16 sps:$4 sm:$0xff]   ;;  %v2569_v14 = vld [vmem:[%s3936_s1 + $0x60] ss:$16 sps:$4 sm:$0xff]   ;;  %v75_v63 = vrot.slane %v2648_v58, %v3167_v52  ;;  %v2694_v58 = vld [vmem:[%s3936_s1 + $0xe8] ss:$16 sps:$4 sm:$0xff]  }
   0x8   :  { %1328 = vmatpush1.bf16.msra.mxu0 %v2558_v7  ;;  %1288 = vmatprep.subr.bf16.mxu1 %v2559_v8  ;;  %v2567_v13 = vld [vmem:[%s3936_s1 + $0x264] ss:$16 sps:$4 sm:$0xff]   ;;  %v2570_v15 = vld [vmem:[%s3936_s1 + $0x260] ss:$16 sps:$4 sm:$0xff]  }
   0x9   :  { %1329 = vmatprep.subr.bf16.mxu0 %v2561_v9  ;;  %v2571_v16 = vld [vmem:[%s3936_s1 + $0x84] ss:$16 sps:$4 sm:$0xff]   ;;  %v2575_v18 = vld [vmem:[%s3936_s1 + $0x80] ss:$16 sps:$4 sm:$0xff]  }
   0xa   :  { %v2573_v17 = vld [vmem:[%s3936_s1 + $0x284] ss:$16 sps:$4 sm:$0xff]   ;;  %v2576_v19 = vld [vmem:[%s3936_s1 + $0x280] ss:$16 sps:$4 sm:$0xff]  }
   0xb   :  { %1289 = vmatpush1.bf16.msra.mxu1 %v2563_v10  ;;  %v2577_v20 = vld [vmem:[%s3936_s1 + $0xa4] ss:$16 sps:$4 sm:$0xff]   ;;  %v2581_v22 = vld [vmem:[%s3936_s1 + $0xa0] ss:$16 sps:$4 sm:$0xff]  }
   0xc   :  { %1330 = vmatpush1.bf16.msra.mxu0 %v2564_v11  ;;  %1290 = vmatprep.subr.bf16.mxu1 %v2565_v12  ;;  %v2579_v21 = vld [vmem:[%s3936_s1 + $0x2a4] ss:$16 sps:$4 sm:$0xff]   ;;  %v2582_v23 = vld [vmem:[%s3936_s1 + $0x2a0] ss:$16 sps:$4 sm:$0xff]  }
   0xd   :  { %1331 = vmatprep.subr.bf16.mxu0 %v2567_v13  ;;  %v2583_v24 = vld [vmem:[%s3936_s1 + $0xc4] ss:$16 sps:$4 sm:$0xff]   ;;  %v2587_v26 = vld [vmem:[%s3936_s1 + $0xc0] ss:$16 sps:$4 sm:$0xff]  }
   0xe   :  { %v2585_v25 = vld [vmem:[%s3936_s1 + $0x2c4] ss:$16 sps:$4 sm:$0xff]   ;;  %v2588_v27 = vld [vmem:[%s3936_s1 + $0x2c0] ss:$16 sps:$4 sm:$0xff]  }
   0xf   :  { %1291 = vmatpush1.bf16.msra.mxu1 %v2569_v14  ;;  %v2589_v28 = vld [vmem:[%s3936_s1 + $0xe4] ss:$16 sps:$4 sm:$0xff]   ;;  %v2593_v30 = vld [vmem:[%s3936_s1 + $0xe0] ss:$16 sps:$4 sm:$0xff]  }
  0x10   :  { %1332 = vmatpush1.bf16.msra.mxu0 %v2570_v15  ;;  %1292 = vmatprep.subr.bf16.mxu1 %v2571_v16  ;;  %v2591_v29 = vld [vmem:[%s3936_s1 + $0x2e4] ss:$16 sps:$4 sm:$0xff]   ;;  %v2594_v31 = vld [vmem:[%s3936_s1 + $0x2e0] ss:$16 sps:$4 sm:$0xff]  }
  0x11   :  { %1333 = vmatprep.subr.bf16.mxu0 %v2573_v17  ;;  %v2595_v32 = vld [vmem:[%s3936_s1 + $0x104] ss:$16 sps:$4 sm:$0xff]   ;;  %v2599_v34 = vld [vmem:[%s3936_s1 + $0x100] ss:$16 sps:$4 sm:$0xff]  }
  0x12   :  { %v2597_v33 = vld [vmem:[%s3936_s1 + $0x304] ss:$16 sps:$4 sm:$0xff]   ;;  %v2600_v35 = vld [vmem:[%s3936_s1 + $0x300] ss:$16 sps:$4 sm:$0xff]  }
  0x13   :  { %1293 = vmatpush1.bf16.msra.mxu1 %v2575_v18  ;;  %v2601_v36 = vld [vmem:[%s3936_s1 + $0x124] ss:$16 sps:$4 sm:$0xff]   ;;  %v2605_v41 = vld [vmem:[%s3936_s1 + $0x120] ss:$16 sps:$4 sm:$0xff]  }
  0x14   :  { %1334 = vmatpush1.bf16.msra.mxu0 %v2576_v19  ;;  %1294 = vmatprep.subr.bf16.mxu1 %v2577_v20  ;;  %v2603_v37 = vld [vmem:[%s3936_s1 + $0x324] ss:$16 sps:$4 sm:$0xff]   ;;  %v2606_v42 = vld [vmem:[%s3936_s1 + $0x320] ss:$16 sps:$4 sm:$0xff]   ;;  %v2654_v20 = vld [vmem:[%s3936_s1 + $0xc] ss:$16 sps:$4 sm:$0xff]  }
  0x15   :  { %1335 = vmatprep.subr.bf16.mxu0 %v2579_v21  ;;  %v2607_v43 = vld [vmem:[%s3936_s1 + $0x144] ss:$16 sps:$4 sm:$0xff]   ;;  %v2611_v47 = vld [vmem:[%s3936_s1 + $0x140] ss:$16 sps:$4 sm:$0xff]  }
  0x16   :  { %v2609_v44 = vld [vmem:[%s3936_s1 + $0x344] ss:$16 sps:$4 sm:$0xff]   ;;  %v2612_v48 = vld [vmem:[%s3936_s1 + $0x340] ss:$16 sps:$4 sm:$0xff]  }
  0x17   :  { %1295 = vmatpush1.bf16.msra.mxu1 %v2581_v22  ;;  %v2613_v49 = vld [vmem:[%s3936_s1 + $0x164] ss:$16 sps:$4 sm:$0xff]   ;;  %v2617_v51 = vld [vmem:[%s3936_s1 + $0x160] ss:$16 sps:$4 sm:$0xff]  }
  0x18   :  { %1336 = vmatpush1.bf16.msra.mxu0 %v2582_v23  ;;  %1296 = vmatprep.subr.bf16.mxu1 %v2583_v24  ;;  %v2615_v50 = vld [vmem:[%s3936_s1 + $0x364] ss:$16 sps:$4 sm:$0xff]   ;;  %v2618_v53 = vld [vmem:[%s3936_s1 + $0x360] ss:$16 sps:$4 sm:$0xff]   ;;  %v2652_v23 = vld [vmem:[%s3936_s1 + $0x8] ss:$16 sps:$4 sm:$0xff]  }
  0x19   :  { %1337 = vmatprep.subr.bf16.mxu0 %v2585_v25  ;;  %v2619_v54 = vld [vmem:[%s3936_s1 + $0x184] ss:$16 sps:$4 sm:$0xff]   ;;  %v2643_v55 = vld [vmem:[%s3935_s0] ss:$12 sps:$4 sm:$0xff]  }
  0x1a   :  { %v2645_v56 = vld [vmem:[%s3935_s0 + $0x18] ss:$12 sps:$4 sm:$0xff]   ;;  %v54_v60 = vrot.slane %v2643_v55, %v3167_v52  ;;  %v2623_v0 = vld [vmem:[%s3936_s1 + $0x180] ss:$16 sps:$4 sm:$0xff]  }
  0x1b   :  { %1297 = vmatpush1.bf16.msra.mxu1 %v2587_v26  ;;  %v2647_v57 = vld [vmem:[%s3935_s0 + $0x4] ss:$12 sps:$4 sm:$0xff]   ;;  %v68_v61 = vrot.slane %v2645_v56, %v3167_v52  ;;  %v2660_v26 = vld [vmem:[%s3936_s1 + $0x2c] ss:$16 sps:$4 sm:$0xff]  }
  0x1c   :  { %1338 = vmatpush1.bf16.msra.mxu0 %v2588_v27  ;;  %1298 = vmatprep.subr.bf16.mxu1 %v2589_v28  ;;  %v2621_v59 = vld [vmem:[%s3936_s1 + $0x384] ss:$16 sps:$4 sm:$0xff]   ;;  %v61_v62 = vrot.slane %v2647_v57, %v3167_v52  ;;  %v2624_v2 = vld [vmem:[%s3936_s1 + $0x380] ss:$16 sps:$4 sm:$0xff]   ;;  %v2658_v28 = vld [vmem:[%s3936_s1 + $0x28] ss:$16 sps:$4 sm:$0xff]  }
  0x1d   :  { %1339 = vmatprep.subr.bf16.mxu0 %v2591_v29  ;;  %v77_v1 = vcombine.high %v54_v60, %v68_v61  ;;  %v2625_v3 = vld [vmem:[%s3936_s1 + $0x1a4] ss:$16 sps:$4 sm:$0xff]   ;;  %v2629_v8 = vld [vmem:[%s3936_s1 + $0x1a0] ss:$16 sps:$4 sm:$0xff]   ;;  %v76_v16 = vcombine.low %v54_v60, %v68_v61  ;;  %v2702_v60 = vld [vmem:[%s3936_s1 + $0x10c] ss:$16 sps:$4 sm:$0xff]  }
  0x1e   :  { %v79_v4 = vcombine.high %v61_v62, %v75_v63  ;;  %v2627_v5 = vld [vmem:[%s3936_s1 + $0x3a4] ss:$16 sps:$4 sm:$0xff]   ;;  %v2630_v9 = vld [vmem:[%s3936_s1 + $0x3a0] ss:$16 sps:$4 sm:$0xff]   ;;  %v78_v18 = vcombine.low %v61_v62, %v75_v63  ;;  %v2700_v63 = vld [vmem:[%s3936_s1 + $0x108] ss:$16 sps:$4 sm:$0xff]  }
  0x1f   :  { %1299 = vmatpush1.bf16.msra.mxu1 %v2593_v30  ;;  %v105_v6 = vpack.c.bf16 %v77_v1, %v77_v1  ;;  %v2631_v10 = vld [vmem:[%s3936_s1 + $0x1c4] ss:$16 sps:$4 sm:$0xff]   ;;  %v2635_v12 = vld [vmem:[%s3936_s1 + $0x1c0] ss:$16 sps:$4 sm:$0xff]   ;;  %v3245_v22 = vpack.c.bf16 %v76_v16, %v76_v16  ;;  %v2666_v30 = vld [vmem:[%s3936_s1 + $0x4c] ss:$16 sps:$4 sm:$0xff]  }
  0x20   :  { %1340 = vmatpush1.bf16.msra.mxu0 %v2594_v31  ;;  %1300 = vmatprep.subr.bf16.mxu1 %v2595_v32  ;;  %v3206_v7 = vpack.c.bf16 %v79_v4, %v79_v4  ;;  %v2633_v11 = vld [vmem:[%s3936_s1 + $0x3c4] ss:$16 sps:$4 sm:$0xff]   ;;  %v2636_v13 = vld [vmem:[%s3936_s1 + $0x3c0] ss:$16 sps:$4 sm:$0xff]   ;;  %v3250_v24 = vpack.c.bf16 %v78_v18, %v78_v18  ;;  %v2664_v32 = vld [vmem:[%s3936_s1 + $0x48] ss:$16 sps:$4 sm:$0xff]  }
  0x21   :  { %1341 = vmatprep.subr.bf16.mxu0 %v2597_v33  ;;  %1316 = vmatprep.mubr.bf16.mxu1 %v105_v6  ;;  %v2637_v14 = vld [vmem:[%s3936_s1 + $0x1e4] ss:$16 sps:$4 sm:$0xff]   ;;  %v2641_v17 = vld [vmem:[%s3936_s1 + $0x1e0] ss:$16 sps:$4 sm:$0xff]   ;;  %v2708_v1 = vld [vmem:[%s3936_s1 + $0x12c] ss:$16 sps:$4 sm:$0xff]  }
  0x22   :  { %1357 = vmatprep.mubr.bf16.mxu0 %v3206_v7  ;;  %v2639_v15 = vld [vmem:[%s3936_s1 + $0x3e4] ss:$16 sps:$4 sm:$0xff]   ;;  %v2642_v19 = vld [vmem:[%s3936_s1 + $0x3e0] ss:$16 sps:$4 sm:$0xff]   ;;  %v2706_v4 = vld [vmem:[%s3936_s1 + $0x128] ss:$16 sps:$4 sm:$0xff]  }
  0x23   :  { %1301 = vmatpush1.bf16.msra.mxu1 %v2599_v34  ;;  %v2651_v21 = vld [vmem:[%s3936_s1 + $0x404] ss:$16 sps:$4 sm:$0xff]   ;;  %v2649_v25 = vld [vmem:[%s3936_s1 + $0x400] ss:$16 sps:$4 sm:$0xff]   ;;  %v2672_v34 = vld [vmem:[%s3936_s1 + $0x6c] ss:$16 sps:$4 sm:$0xff]  }
  0x24   :  { %1342 = vmatpush1.bf16.msra.mxu0 %v2600_v35  ;;  %1302 = vmatprep.subr.bf16.mxu1 %v2601_v36  ;;  %v2657_v27 = vld [vmem:[%s3936_s1 + $0x424] ss:$16 sps:$4 sm:$0xff]   ;;  %v2655_v29 = vld [vmem:[%s3936_s1 + $0x420] ss:$16 sps:$4 sm:$0xff]   ;;  %v2670_v36 = vld [vmem:[%s3936_s1 + $0x68] ss:$16 sps:$4 sm:$0xff]  }
  0x25   :  { %1343 = vmatprep.subr.bf16.mxu0 %v2603_v37  ;;  %v2663_v31 = vld [vmem:[%s3936_s1 + $0x444] ss:$16 sps:$4 sm:$0xff]   ;;  %v2661_v33 = vld [vmem:[%s3936_s1 + $0x440] ss:$16 sps:$4 sm:$0xff]   ;;  %v2732_v18 = vld [vmem:[%s3936_s1 + $0x1ac] ss:$16 sps:$4 sm:$0xff]  }
  0x26   :  { %v2669_v35 = vld [vmem:[%s3936_s1 + $0x464] ss:$16 sps:$4 sm:$0xff]   ;;  %v2667_v37 = vld [vmem:[%s3936_s1 + $0x460] ss:$16 sps:$4 sm:$0xff]  }
  0x27   :  { %1303 = vmatpush1.bf16.msra.mxu1 %v2605_v41  ;;  %v2675_v39 = vld [vmem:[%s3936_s1 + $0x484] ss:$16 sps:$4 sm:$0xff]   ;;  %v2673_v41 = vld [vmem:[%s3936_s1 + $0x480] ss:$16 sps:$4 sm:$0xff]  }
  0x28   :  { %1344 = vmatpush1.bf16.msra.mxu0 %v2606_v42  ;;  %1304 = vmatprep.subr.bf16.mxu1 %v2607_v43  ;;  %v2684_v42 = vld [vmem:[%s3936_s1 + $0xac] ss:$16 sps:$4 sm:$0xff]   ;;  %v2681_v43 = vld [vmem:[%s3936_s1 + $0x4a4] ss:$16 sps:$4 sm:$0xff]   ;;  %v2679_v45 = vld [vmem:[%s3936_s1 + $0x4a0] ss:$16 sps:$4 sm:$0xff]  }
  0x29   :  { %1345 = vmatprep.subr.bf16.mxu0 %v2609_v44  ;;  %v2682_v44 = vld [vmem:[%s3936_s1 + $0xa8] ss:$16 sps:$4 sm:$0xff]   ;;  %v2746_v55 = vld [vmem:[%s3935_s0 + $0x20] ss:$12 sps:$4 sm:$0xff]   ;;  %v2699_v61 = vld [vmem:[%s3936_s1 + $0x504] ss:$16 sps:$4 sm:$0xff]  }
  0x2a   :  { %v2691_v57 = vld [vmem:[%s3936_s1 + $0x4e0] ss:$16 sps:$4 sm:$0xff]  }
  0x2b   :  { %1305 = vmatpush1.bf16.msra.mxu1 %v2611_v47  ;;  %v2690_v47 = vld [vmem:[%s3936_s1 + $0xcc] ss:$16 sps:$4 sm:$0xff]   ;;  %v2721_v16 = vld [vmem:[%s3936_s1 + $0x580] ss:$16 sps:$4 sm:$0xff]  }
  0x2c   :  { %1346 = vmatpush1.bf16.msra.mxu0 %v2612_v48  ;;  %1306 = vmatprep.subr.bf16.mxu1 %v2613_v49  ;;  %v2687_v48 = vld [vmem:[%s3936_s1 + $0x4c4] ss:$16 sps:$4 sm:$0xff]   ;;  %v2685_v49 = vld [vmem:[%s3936_s1 + $0x4c0] ss:$16 sps:$4 sm:$0xff]  }
  0x2d   :  { %1347 = vmatprep.subr.bf16.mxu0 %v2615_v50  ;;  %v2688_v50 = vld [vmem:[%s3936_s1 + $0xc8] ss:$16 sps:$4 sm:$0xff]  }
  0x2f   :  { %1307 = vmatpush1.bf16.msra.mxu1 %v2617_v51  ;;  %v2693_v51 = vld [vmem:[%s3936_s1 + $0x4e4] ss:$16 sps:$4 sm:$0xff]  }
  0x30   :  { %1348 = vmatpush1.bf16.msra.mxu0 %v2618_v53  ;;  %1308 = vmatprep.subr.bf16.mxu1 %v2619_v54  ;;  %v2696_v53 = vld [vmem:[%s3936_s1 + $0xec] ss:$16 sps:$4 sm:$0xff]   ;;  %v2745_v54 = vld [vmem:[%s3935_s0 + $0x8] ss:$12 sps:$4 sm:$0xff]  }
  0x31   :  { %1349 = vmatprep.subr.bf16.mxu0 %v2621_v59  ;;  %v3342_v56 = vrot.slane %v2745_v54, %v3167_v52  ;;  %v3351_v59 = vrot.slane %v2746_v55, %v3167_v52  ;;  %v2697_v52 = vld [vmem:[%s3936_s1 + $0x500] ss:$16 sps:$4 sm:$0xff]   ;;  %v2773_v54 = vld [vmem:[%s3936_s1 + $0x30c] ss:$16 sps:$4 sm:$0xff]  }
  0x32   :  { %v2851_v55 = vld [vmem:[%s3938_s3 + $0x24] ss:$8 sps:$4 sm:$0xff]  }
  0x33   :  { %1309 = vmatpush1.bf16.msra.mxu1 %v2623_v0  ;;  %v97_v62 = vcombine.high %v3342_v56, %v3351_v59 }
  0x34   :  { %1350 = vmatpush1.bf16.msra.mxu0 %v2624_v2  ;;  %1310 = vmatprep.subr.bf16.mxu1 %v2625_v3  ;;  %v2705_v2 = vld [vmem:[%s3936_s1 + $0x524] ss:$16 sps:$4 sm:$0xff]   ;;  %v2703_v3 = vld [vmem:[%s3936_s1 + $0x520] ss:$16 sps:$4 sm:$0xff]  }
  0x35   :  { %1351 = vmatprep.subr.bf16.mxu0 %v2627_v5  ;;  %v3367_v0 = vpack.c.bf16 %v97_v62, %v97_v62  ;;  %v2714_v5 = vld [vmem:[%s3936_s1 + $0x14c] ss:$16 sps:$4 sm:$0xff]  }
  0x36   :  { %v2779_v62 = vld [vmem:[%s3936_s1 + $0x34c] ss:$16 sps:$4 sm:$0xff]  }
  0x37   :  { %1311 = vmatpush1.bf16.msra.mxu1 %v2629_v8  ;;  %v2709_v8 = vld [vmem:[%s3936_s1 + $0x540] ss:$16 sps:$4 sm:$0xff]  }
  0x38   :  { %1352 = vmatpush1.bf16.msra.mxu0 %v2630_v9  ;;  %1312 = vmatprep.subr.bf16.mxu1 %v2631_v10  ;;  %v2712_v9 = vld [vmem:[%s3936_s1 + $0x148] ss:$16 sps:$4 sm:$0xff]   ;;  %v2720_v10 = vld [vmem:[%s3936_s1 + $0x16c] ss:$16 sps:$4 sm:$0xff]  }
  0x39   :  { %1353 = vmatprep.subr.bf16.mxu0 %v2633_v11  ;;  %v2717_v11 = vld [vmem:[%s3936_s1 + $0x564] ss:$16 sps:$4 sm:$0xff]  }
  0x3b   :  { %1313 = vmatpush1.bf16.msra.mxu1 %v2635_v12  ;;  %v2715_v12 = vld [vmem:[%s3936_s1 + $0x560] ss:$16 sps:$4 sm:$0xff]  }
  0x3c   :  { %1354 = vmatpush1.bf16.msra.mxu0 %v2636_v13  ;;  %1314 = vmatprep.subr.bf16.mxu1 %v2637_v14  ;;  %v2718_v13 = vld [vmem:[%s3936_s1 + $0x168] ss:$16 sps:$4 sm:$0xff]   ;;  %v2726_v14 = vld [vmem:[%s3936_s1 + $0x18c] ss:$16 sps:$4 sm:$0xff]  }
  0x3d   :  { %1355 = vmatprep.subr.bf16.mxu0 %v2639_v15  ;;  %v2723_v15 = vld [vmem:[%s3936_s1 + $0x584] ss:$16 sps:$4 sm:$0xff]  }
  0x3f   :  { %1315 = vmatpush1.bf16.msra.mxu1 %v2641_v17  ;;  %v2724_v17 = vld [vmem:[%s3936_s1 + $0x188] ss:$16 sps:$4 sm:$0xff]  }
  0x40   :  { %1356 = vmatpush1.bf16.msra.mxu0 %v2642_v19  ;;  %1407 = vmatprep.subr.bf16.mxu1 %v2654_v20  ;;  %v2729_v19 = vld [vmem:[%s3936_s1 + $0x5a4] ss:$16 sps:$4 sm:$0xff]   ;;  %v2727_v20 = vld [vmem:[%s3936_s1 + $0x5a0] ss:$16 sps:$4 sm:$0xff]  }
  0x41   :  { %1366 = vmatprep.subr.bf16.mxu0 %v2651_v21  ;;  %v2730_v21 = vld [vmem:[%s3936_s1 + $0x1a8] ss:$16 sps:$4 sm:$0xff]  }
  0x42   :  { %1317 = vmatmul.mubr.bf16.vlgmr.msra.gmra.mrb[0].mxu1 %v3245_v22 }
  0x43   :  { %1358 = vmatmul.mubr.bf16.vlgmr.msra.gmra.mrb[0].mxu0 %v3250_v24  ;;  %1408 = vmatpush1.bf16.msra.mxu1 %v2652_v23  ;;  %v2738_v23 = vld [vmem:[%s3936_s1 + $0x1cc] ss:$16 sps:$4 sm:$0xff]  }
  0x44   :  { %1367 = vmatpush1.bf16.msra.mxu0 %v2649_v25  ;;  %1409 = vmatprep.subr.bf16.mxu1 %v2660_v26  ;;  %v2735_v25 = vld [vmem:[%s3936_s1 + $0x5c4] ss:$16 sps:$4 sm:$0xff]   ;;  %v2733_v26 = vld [vmem:[%s3936_s1 + $0x5c0] ss:$16 sps:$4 sm:$0xff]  }
  0x45   :  { %1368 = vmatprep.subr.bf16.mxu0 %v2657_v27  ;;  %1439 = vmatprep.mubr.bf16.mxu1 %v105_v6  ;;  %v2711_v6 = vld [vmem:[%s3936_s1 + $0x544] ss:$16 sps:$4 sm:$0xff]   ;;  %v2736_v27 = vld [vmem:[%s3936_s1 + $0x1c8] ss:$16 sps:$4 sm:$0xff]  }
  0x46   :  { %1398 = vmatprep.mubr.bf16.mxu0 %v3367_v0 }
  0x47   :  { %1410 = vmatpush1.bf16.msra.mxu1 %v2658_v28  ;;  %v2744_v28 = vld [vmem:[%s3936_s1 + $0x1ec] ss:$16 sps:$4 sm:$0xff]  }
  0x48   :  { %1369 = vmatpush1.bf16.msra.mxu0 %v2655_v29  ;;  %1411 = vmatprep.subr.bf16.mxu1 %v2666_v30  ;;  %v2741_v29 = vld [vmem:[%s3936_s1 + $0x5e4] ss:$16 sps:$4 sm:$0xff]   ;;  %v2739_v30 = vld [vmem:[%s3936_s1 + $0x5e0] ss:$16 sps:$4 sm:$0xff]  }
  0x49   :  { %1370 = vmatprep.subr.bf16.mxu0 %v2663_v31  ;;  %v2742_v31 = vld [vmem:[%s3936_s1 + $0x1e8] ss:$16 sps:$4 sm:$0xff]  }
  0x4b   :  { %1412 = vmatpush1.bf16.msra.mxu1 %v2664_v32  ;;  %v96_v32 = vcombine.low %v3342_v56, %v3351_v59  ;;  %v2771_v56 = vld [vmem:[%s3936_s1 + $0x308] ss:$16 sps:$4 sm:$0xff]   ;;  %v2854_v59 = vld [vmem:[%s3938_s3 + $0x34] ss:$8 sps:$4 sm:$0xff]  }
  0x4c   :  { %1371 = vmatpush1.bf16.msra.mxu0 %v2661_v33  ;;  %1413 = vmatprep.subr.bf16.mxu1 %v2672_v34  ;;  %v2749_v33 = vld [vmem:[%s3936_s1 + $0x20c] ss:$16 sps:$4 sm:$0xff]  }
  0x4d   :  { %1372 = vmatprep.subr.bf16.mxu0 %v2669_v35  ;;  %v3459_v34 = vpack.c.bf16 %v96_v32, %v96_v32  ;;  %v2747_v35 = vld [vmem:[%s3936_s1 + $0x208] ss:$16 sps:$4 sm:$0xff]   ;;  %v2803_v32 = vld [vmem:[%s3936_s1 + $0x44c] ss:$16 sps:$4 sm:$0xff]  }
  0x4f   :  { %1414 = vmatpush1.bf16.msra.mxu1 %v2670_v36  ;;  %v2752_v36 = vld [vmem:[%s3936_s1 + $0x22c] ss:$16 sps:$4 sm:$0xff]  }
  0x50   :  { %1373 = vmatpush1.bf16.msra.mxu0 %v2667_v37  ;;  %1415 = vmatprep.subr.bf16.mxu1 %v2678_v38  ;;  %v2750_v37 = vld [vmem:[%s3936_s1 + $0x228] ss:$16 sps:$4 sm:$0xff]   ;;  %v2755_v38 = vld [vmem:[%s3936_s1 + $0x24c] ss:$16 sps:$4 sm:$0xff]  }
  0x51   :  { %1374 = vmatprep.subr.bf16.mxu0 %v2675_v39  ;;  %v2753_v39 = vld [vmem:[%s3936_s1 + $0x248] ss:$16 sps:$4 sm:$0xff]  }
  0x53   :  { %1416 = vmatpush1.bf16.msra.mxu1 %v2676_v40  ;;  %v2756_v40 = vld [vmem:[%s3936_s1 + $0x268] ss:$16 sps:$4 sm:$0xff]  }
  0x54   :  { %1375 = vmatpush1.bf16.msra.mxu0 %v2673_v41  ;;  %1417 = vmatprep.subr.bf16.mxu1 %v2684_v42  ;;  %v2761_v41 = vld [vmem:[%s3936_s1 + $0x28c] ss:$16 sps:$4 sm:$0xff]  }
  0x55   :  { %1376 = vmatprep.subr.bf16.mxu0 %v2681_v43  ;;  %v2764_v42 = vld [vmem:[%s3936_s1 + $0x2ac] ss:$16 sps:$4 sm:$0xff]   ;;  %v2762_v43 = vld [vmem:[%s3936_s1 + $0x2a8] ss:$16 sps:$4 sm:$0xff]  }
  0x57   :  { %1418 = vmatpush1.bf16.msra.mxu1 %v2682_v44  ;;  %v2767_v44 = vld [vmem:[%s3936_s1 + $0x2cc] ss:$16 sps:$4 sm:$0xff]  }
  0x58   :  { %1377 = vmatpush1.bf16.msra.mxu0 %v2679_v45  ;;  %1419 = vmatprep.subr.bf16.mxu1 %v2690_v47  ;;  %v2765_v45 = vld [vmem:[%s3936_s1 + $0x2c8] ss:$16 sps:$4 sm:$0xff]   ;;  %v2770_v47 = vld [vmem:[%s3936_s1 + $0x2ec] ss:$16 sps:$4 sm:$0xff]  }
  0x59   :  { %1378 = vmatprep.subr.bf16.mxu0 %v2687_v48  ;;  %v2843_v48 = vld [vmem:[%s3938_s3] ss:$8 sps:$4 sm:$0xff]  }
  0x5b   :  { %1420 = vmatpush1.bf16.msra.mxu1 %v2688_v50  ;;  %v2848_v50 = vld [vmem:[%s3938_s3 + $0x14] ss:$8 sps:$4 sm:$0xff]  }
  0x5c   :  { %1379 = vmatpush1.bf16.msra.mxu0 %v2685_v49  ;;  %1421 = vmatprep.subr.bf16.mxu1 %v2696_v53  ;;  %v2845_v49 = vld [vmem:[%s3938_s3 + $0x4] ss:$8 sps:$4 sm:$0xff]   ;;  %v2846_v53 = vld [vmem:[%s3938_s3 + $0x10] ss:$8 sps:$4 sm:$0xff]  }
  0x5d   :  { %1380 = vmatprep.subr.bf16.mxu0 %v2693_v51  ;;  %v2768_v51 = vld [vmem:[%s3936_s1 + $0x2e8] ss:$16 sps:$4 sm:$0xff]  }
  0x5f   :  { %1422 = vmatpush1.bf16.msra.mxu1 %v2694_v58  ;;  %v2776_v58 = vld [vmem:[%s3936_s1 + $0x32c] ss:$16 sps:$4 sm:$0xff]  }
  0x60   :  { %1381 = vmatpush1.bf16.msra.mxu0 %v2691_v57  ;;  %1423 = vmatprep.subr.bf16.mxu1 %v2702_v60  ;;  %v2849_v57 = vld [vmem:[%s3938_s3 + $0x20] ss:$8 sps:$4 sm:$0xff]  }
  0x61   :  { %1382 = vmatprep.subr.bf16.mxu0 %v2699_v61  ;;  %v2774_v60 = vld [vmem:[%s3936_s1 + $0x328] ss:$16 sps:$4 sm:$0xff]  }
  0x62   :  { %v2852_v61 = vld [vmem:[%s3938_s3 + $0x30] ss:$8 sps:$4 sm:$0xff]  }
  0x63   :  { %1424 = vmatpush1.bf16.msra.mxu1 %v2700_v63  ;;  %v2777_v63 = vld [vmem:[%s3936_s1 + $0x348] ss:$16 sps:$4 sm:$0xff]  }
  0x64   :  { %1383 = vmatpush1.bf16.msra.mxu0 %v2697_v52  ;;  %1425 = vmatprep.subr.bf16.mxu1 %v2708_v1  ;;  %v2857_v52 = vld [vmem:[%s3938_s3 + $0x44] ss:$8 sps:$4 sm:$0xff]   ;;  %v2855_v1 = vld [vmem:[%s3938_s3 + $0x40] ss:$8 sps:$4 sm:$0xff]  }
  0x65   :  { %1384 = vmatprep.subr.bf16.mxu0 %v2705_v2  ;;  %v2782_v2 = vld [vmem:[%s3936_s1 + $0x36c] ss:$16 sps:$4 sm:$0xff]  }
  0x67   :  { %1426 = vmatpush1.bf16.msra.mxu1 %v2706_v4  ;;  %v2780_v4 = vld [vmem:[%s3936_s1 + $0x368] ss:$16 sps:$4 sm:$0xff]  }
  0x68   :  { %1385 = vmatpush1.bf16.msra.mxu0 %v2703_v3  ;;  %1427 = vmatprep.subr.bf16.mxu1 %v2714_v5  ;;  %v2860_v3 = vld [vmem:[%s3938_s3 + $0x54] ss:$8 sps:$4 sm:$0xff]   ;;  %v2858_v5 = vld [vmem:[%s3938_s3 + $0x50] ss:$8 sps:$4 sm:$0xff]  }
  0x69   :  { %1386 = vmatprep.subr.bf16.mxu0 %v2711_v6  ;;  %v2785_v6 = vld [vmem:[%s3936_s1 + $0x38c] ss:$16 sps:$4 sm:$0xff]  }
  0x6b   :  { %1428 = vmatpush1.bf16.msra.mxu1 %v2712_v9  ;;  %v2783_v9 = vld [vmem:[%s3936_s1 + $0x388] ss:$16 sps:$4 sm:$0xff]  }
  0x6c   :  { %1387 = vmatpush1.bf16.msra.mxu0 %v2709_v8  ;;  %1429 = vmatprep.subr.bf16.mxu1 %v2720_v10  ;;  %v2863_v8 = vld [vmem:[%s3938_s3 + $0x64] ss:$8 sps:$4 sm:$0xff]   ;;  %v2861_v10 = vld [vmem:[%s3938_s3 + $0x60] ss:$8 sps:$4 sm:$0xff]  }
  0x6d   :  { %1388 = vmatprep.subr.bf16.mxu0 %v2717_v11  ;;  %v2788_v11 = vld [vmem:[%s3936_s1 + $0x3ac] ss:$16 sps:$4 sm:$0xff]  }
  0x6f   :  { %1430 = vmatpush1.bf16.msra.mxu1 %v2718_v13  ;;  %v2786_v13 = vld [vmem:[%s3936_s1 + $0x3a8] ss:$16 sps:$4 sm:$0xff]  }
  0x70   :  { %1389 = vmatpush1.bf16.msra.mxu0 %v2715_v12  ;;  %1431 = vmatprep.subr.bf16.mxu1 %v2726_v14  ;;  %v2866_v12 = vld [vmem:[%s3938_s3 + $0x74] ss:$8 sps:$4 sm:$0xff]   ;;  %v2864_v14 = vld [vmem:[%s3938_s3 + $0x70] ss:$8 sps:$4 sm:$0xff]  }
  0x71   :  { %1390 = vmatprep.subr.bf16.mxu0 %v2723_v15  ;;  %v2791_v15 = vld [vmem:[%s3936_s1 + $0x3cc] ss:$16 sps:$4 sm:$0xff]  }
  0x73   :  { %1432 = vmatpush1.bf16.msra.mxu1 %v2724_v17  ;;  %v2789_v17 = vld [vmem:[%s3936_s1 + $0x3c8] ss:$16 sps:$4 sm:$0xff]  }
  0x74   :  { %1391 = vmatpush1.bf16.msra.mxu0 %v2721_v16  ;;  %1433 = vmatprep.subr.bf16.mxu1 %v2732_v18  ;;  %v2869_v16 = vld [vmem:[%s3938_s3 + $0x84] ss:$8 sps:$4 sm:$0xff]   ;;  %v2867_v18 = vld [vmem:[%s3938_s3 + $0x80] ss:$8 sps:$4 sm:$0xff]  }
  0x75   :  { %1392 = vmatprep.subr.bf16.mxu0 %v2729_v19  ;;  %v2794_v19 = vld [vmem:[%s3936_s1 + $0x3ec] ss:$16 sps:$4 sm:$0xff]  }
  0x77   :  { %1434 = vmatpush1.bf16.msra.mxu1 %v2730_v21  ;;  %v2792_v21 = vld [vmem:[%s3936_s1 + $0x3e8] ss:$16 sps:$4 sm:$0xff]  }
  0x78   :  { %1393 = vmatpush1.bf16.msra.mxu0 %v2727_v20  ;;  %1435 = vmatprep.subr.bf16.mxu1 %v2738_v23  ;;  %v2872_v20 = vld [vmem:[%s3938_s3 + $0x94] ss:$8 sps:$4 sm:$0xff]   ;;  %v2870_v23 = vld [vmem:[%s3938_s3 + $0x90] ss:$8 sps:$4 sm:$0xff]  }
  0x79   :  { %1394 = vmatprep.subr.bf16.mxu0 %v2735_v25  ;;  %v2797_v25 = vld [vmem:[%s3936_s1 + $0x40c] ss:$16 sps:$4 sm:$0xff]  }
  0x7b   :  { %1436 = vmatpush1.bf16.msra.mxu1 %v2736_v27  ;;  %v2795_v27 = vld [vmem:[%s3936_s1 + $0x408] ss:$16 sps:$4 sm:$0xff]  }
  0x7c   :  { %1395 = vmatpush1.bf16.msra.mxu0 %v2733_v26  ;;  %1437 = vmatprep.subr.bf16.mxu1 %v2744_v28  ;;  %v2875_v26 = vld [vmem:[%s3938_s3 + $0xa4] ss:$8 sps:$4 sm:$0xff]  }
  0x7d   :  { %1396 = vmatprep.subr.bf16.mxu0 %v2741_v29  ;;  %v2800_v28 = vld [vmem:[%s3936_s1 + $0x42c] ss:$16 sps:$4 sm:$0xff]   ;;  %v2873_v29 = vld [vmem:[%s3938_s3 + $0xa0] ss:$8 sps:$4 sm:$0xff]  }
  0x7f   :  { %1438 = vmatpush1.bf16.msra.mxu1 %v2742_v31  ;;  %v2798_v31 = vld [vmem:[%s3936_s1 + $0x428] ss:$16 sps:$4 sm:$0xff]  }
  0x80   :  { %1397 = vmatpush1.bf16.msra.mxu0 %v2739_v30  ;;  %1448 = vmatprep.subr.bf16.mxu1 %v2749_v33  ;;  %v2878_v30 = vld [vmem:[%s3938_s3 + $0xb4] ss:$8 sps:$4 sm:$0xff]   ;;  %v2876_v33 = vld [vmem:[%s3938_s3 + $0xb0] ss:$8 sps:$4 sm:$0xff]  }
  0x81   :  { %1942 = vmatprep.subr.bf16.mxu0 %v2845_v49  ;;  %v2816_v49 = vld [vmem:[%s3936_s1 + $0x4e8] ss:$16 sps:$4 sm:$0xff]  }
  0x82   :  { %1440 = vmatmul.mubr.bf16.vlgmr.msra.gmra.mrb[4].mxu1 %v3245_v22  ;;  %v2758_v22 = vld [vmem:[%s3936_s1 + $0x26c] ss:$16 sps:$4 sm:$0xff]  }
  0x83   :  { %1399 = vmatmul.mubr.bf16.vlgmr.msra.gmra.mrb[0].mxu0 %v3459_v34  ;;  %1449 = vmatpush1.bf16.msra.mxu1 %v2747_v35  ;;  %v2806_v35 = vld [vmem:[%s3936_s1 + $0x46c] ss:$16 sps:$4 sm:$0xff]  }
  0x84   :  { %1450 = vmatprep.subr.bf16.mxu1 %v2752_v36  ;;  %1480 = vmatprep.mubr.bf16.mxu1 %v3206_v7  ;;  %v2759_v7 = vld [vmem:[%s3936_s1 + $0x288] ss:$16 sps:$4 sm:$0xff]  }
  0x85   :  { %1943 = vmatpush1.bf16.msra.mxu0 %v2843_v48  ;;  %v2879_v36 = vld [vmem:[%s3938_s3 + $0xc0] ss:$8 sps:$4 sm:$0xff]   ;;  %v2890_v48 = vld [vmem:[%s3938_s3 + $0xf4] ss:$8 sps:$4 sm:$0xff]  }
  0x86   :  { %1944 = vmatprep.subr.bf16.mxu0 %v2848_v50  ;;  %v2888_v50 = vld [vmem:[%s3938_s3 + $0xf0] ss:$8 sps:$4 sm:$0xff]  }
  0x87   :  { %1451 = vmatpush1.bf16.msra.mxu1 %v2750_v37  ;;  %v2884_v37 = vld [vmem:[%s3938_s3 + $0xd4] ss:$8 sps:$4 sm:$0xff]  }
  0x88   :  { %1452 = vmatprep.subr.bf16.mxu1 %v2755_v38  ;;  %v2804_v38 = vld [vmem:[%s3936_s1 + $0x468] ss:$16 sps:$4 sm:$0xff]  }
  0x89   :  { %1945 = vmatpush1.bf16.msra.mxu0 %v2846_v53  ;;  %v2819_v53 = vld [vmem:[%s3936_s1 + $0x508] ss:$16 sps:$4 sm:$0xff]  }
  0x8a   :  { %1946 = vmatprep.subr.bf16.mxu0 %v2851_v55  ;;  %v2893_v55 = vld [vmem:[%s3938_s3 + $0x104] ss:$8 sps:$4 sm:$0xff]  }
  0x8b   :  { %1453 = vmatpush1.bf16.msra.mxu1 %v2753_v39  ;;  %v2809_v39 = vld [vmem:[%s3936_s1 + $0x48c] ss:$16 sps:$4 sm:$0xff]  }
  0x8c   :  { %1454 = vmatprep.subr.bf16.mxu1 %v2758_v22  ;;  %v2882_v22 = vld [vmem:[%s3938_s3 + $0xd0] ss:$8 sps:$4 sm:$0xff]  }
  0x8d   :  { %1947 = vmatpush1.bf16.msra.mxu0 %v2849_v57  ;;  %v2827_v57 = vld [vmem:[%s3936_s1 + $0x54c] ss:$16 sps:$4 sm:$0xff]  }
  0x8e   :  { %1948 = vmatprep.subr.bf16.mxu0 %v2854_v59  ;;  %v2830_v59 = vld [vmem:[%s3936_s1 + $0x56c] ss:$16 sps:$4 sm:$0xff]  }
  0x8f   :  { %1455 = vmatpush1.bf16.msra.mxu1 %v2756_v40  ;;  %v2807_v40 = vld [vmem:[%s3936_s1 + $0x488] ss:$16 sps:$4 sm:$0xff]  }
  0x90   :  { %1456 = vmatprep.subr.bf16.mxu1 %v2761_v41  ;;  %v2812_v41 = vld [vmem:[%s3936_s1 + $0x4ac] ss:$16 sps:$4 sm:$0xff]  }
  0x91   :  { %1949 = vmatpush1.bf16.msra.mxu0 %v2852_v61  ;;  %v2833_v61 = vld [vmem:[%s3936_s1 + $0x58c] ss:$16 sps:$4 sm:$0xff]  }
  0x92   :  { %1950 = vmatprep.subr.bf16.mxu0 %v2857_v52  ;;  %v2836_v52 = vld [vmem:[%s3936_s1 + $0x5ac] ss:$16 sps:$4 sm:$0xff]  }
  0x93   :  { %1457 = vmatpush1.bf16.msra.mxu1 %v2759_v7  ;;  %v2810_v7 = vld [vmem:[%s3936_s1 + $0x4a8] ss:$16 sps:$4 sm:$0xff]  }
  0x94   :  { %1458 = vmatprep.subr.bf16.mxu1 %v2764_v42  ;;  %v2815_v42 = vld [vmem:[%s3936_s1 + $0x4cc] ss:$16 sps:$4 sm:$0xff]  }
  0x95   :  { %1951 = vmatpush1.bf16.msra.mxu0 %v2855_v1  ;;  %v2839_v1 = vld [vmem:[%s3936_s1 + $0x5cc] ss:$16 sps:$4 sm:$0xff]  }
  0x96   :  { %1952 = vmatprep.subr.bf16.mxu0 %v2860_v3  ;;  %v2842_v3 = vld [vmem:[%s3936_s1 + $0x5ec] ss:$16 sps:$4 sm:$0xff]  }
  0x97   :  { %1459 = vmatpush1.bf16.msra.mxu1 %v2762_v43  ;;  %v2887_v43 = vld [vmem:[%s3938_s3 + $0xe4] ss:$8 sps:$4 sm:$0xff]  }
  0x98   :  { %1460 = vmatprep.subr.bf16.mxu1 %v2767_v44  ;;  %v2813_v44 = vld [vmem:[%s3936_s1 + $0x4c8] ss:$16 sps:$4 sm:$0xff]  }
  0x99   :  { %1953 = vmatpush1.bf16.msra.mxu0 %v2858_v5 }
  0x9a   :  { %1954 = vmatprep.subr.bf16.mxu0 %v2863_v8 }
  0x9b   :  { %1461 = vmatpush1.bf16.msra.mxu1 %v2765_v45  ;;  %v2885_v45 = vld [vmem:[%s3938_s3 + $0xe0] ss:$8 sps:$4 sm:$0xff]  }
  0x9c   :  { %1462 = vmatprep.subr.bf16.mxu1 %v2770_v47  ;;  %v2818_v47 = vld [vmem:[%s3936_s1 + $0x4ec] ss:$16 sps:$4 sm:$0xff]  }
  0x9d   :  { %1955 = vmatpush1.bf16.msra.mxu0 %v2861_v10  ;;  %v306_v10 = vsub.s32 0, %v3149_v46 }
  0x9e   :  { %1956 = vmatprep.subr.bf16.mxu0 %v2866_v12  ;;  %v310_v12 = vsub.s32 1, %v3149_v46 }
  0x9f   :  { %1463 = vmatpush1.bf16.msra.mxu1 %v2768_v51  ;;  %v2821_v51 = vld [vmem:[%s3936_s1 + $0x50c] ss:$16 sps:$4 sm:$0xff]  }
  0xa0   :  { %1464 = vmatprep.subr.bf16.mxu1 %v2773_v54  ;;  %v2824_v54 = vld [vmem:[%s3936_s1 + $0x52c] ss:$16 sps:$4 sm:$0xff]  }
  0xa1   :  { %1957 = vmatpush1.bf16.msra.mxu0 %v2864_v14 }
  0xa2   :  { %1958 = vmatprep.subr.bf16.mxu0 %v2869_v16 }
  0xa3   :  { %1465 = vmatpush1.bf16.msra.mxu1 %v2771_v56  ;;  %v2822_v56 = vld [vmem:[%s3936_s1 + $0x528] ss:$16 sps:$4 sm:$0xff]  }
  0xa4   :  { %1466 = vmatprep.subr.bf16.mxu1 %v2776_v58  ;;  %v2825_v58 = vld [vmem:[%s3936_s1 + $0x548] ss:$16 sps:$4 sm:$0xff]  }
  0xa5   :  { %1959 = vmatpush1.bf16.msra.mxu0 %v2867_v18 }
  0xa6   :  { %1960 = vmatprep.subr.bf16.mxu0 %v2872_v20 }
  0xa7   :  { %1467 = vmatpush1.bf16.msra.mxu1 %v2774_v60  ;;  %v2828_v60 = vld [vmem:[%s3936_s1 + $0x568] ss:$16 sps:$4 sm:$0xff]  }
  0xa8   :  { %1468 = vmatprep.subr.bf16.mxu1 %v2779_v62  ;;  %v2831_v62 = vld [vmem:[%s3936_s1 + $0x588] ss:$16 sps:$4 sm:$0xff]  }
  0xa9   :  { %1961 = vmatpush1.bf16.msra.mxu0 %v2870_v23 }
  0xaa   :  { %1962 = vmatprep.subr.bf16.mxu0 %v2875_v26 }
  0xab   :  { %1469 = vmatpush1.bf16.msra.mxu1 %v2777_v63  ;;  %v2834_v63 = vld [vmem:[%s3936_s1 + $0x5a8] ss:$16 sps:$4 sm:$0xff]  }
  0xac   :  { %1470 = vmatprep.subr.bf16.mxu1 %v2782_v2  ;;  %v2837_v2 = vld [vmem:[%s3936_s1 + $0x5c8] ss:$16 sps:$4 sm:$0xff]  }
  0xad   :  { %1963 = vmatpush1.bf16.msra.mxu0 %v2873_v29  ;;  %v2891_v29 = vld [vmem:[%s3938_s3 + $0x100] ss:$8 sps:$4 sm:$0xff]  }
  0xae   :  { %1964 = vmatprep.subr.bf16.mxu0 %v2878_v30 }
  0xaf   :  { %1471 = vmatpush1.bf16.msra.mxu1 %v2780_v4  ;;  %v2840_v4 = vld [vmem:[%s3936_s1 + $0x5e8] ss:$16 sps:$4 sm:$0xff]  }
  0xb0   :  { %1472 = vmatprep.subr.bf16.mxu1 %v2785_v6 }
  0xb1   :  { %1965 = vmatpush1.bf16.msra.mxu0 %v2876_v33  ;;  %v2940_v33 = vld [vmem:[%s3940_s5] sm:$0xff]  }
  0xb3   :  { %1473 = vmatpush1.bf16.msra.mxu1 %v2783_v9 }
  0xb4   :  { %1474 = vmatprep.subr.bf16.mxu1 %v2788_v11  ;;  %v3759_v11 = vld [vmem:[%s3937_s2] sm:$0xf] }
  0xb7   :  { %1475 = vmatpush1.bf16.msra.mxu1 %v2786_v13  ;;  %v307_v13 = vrot.slane %v3759_v11, %v306_v10 }
  0xb8   :  { %1476 = vmatprep.subr.bf16.mxu1 %v2791_v15 }
  0xbb   :  { %1477 = vmatpush1.bf16.msra.mxu1 %v2789_v17 }
  0xbc   :  { %1478 = vmatprep.subr.bf16.mxu1 %v2794_v19 }
  0xbf   :  { %1479 = vmatpush1.bf16.msra.mxu1 %v2792_v21 }
  0xc0   :  { %1489 = vmatprep.subr.bf16.mxu1 %v2797_v25 }
  0xc2   :  { %1481 = vmatmul.mubr.bf16.vlgmr.msra.gmra.mrb[4].mxu1 %v3250_v24  ;;  %v2881_v24 = vld [vmem:[%s3938_s3 + $0xc4] ss:$8 sps:$4 sm:$0xff]  }
  0xc3   :  { %1490 = vmatpush1.bf16.msra.mxu1 %v2795_v27  ;;  %1521 = vmatprep.mubr.bf16.mxu1 %v3367_v0  ;;  %v2801_v0 = vld [vmem:[%s3936_s1 + $0x448] ss:$16 sps:$4 sm:$0xff]  }
  0xc4   :  { %1491 = vmatprep.subr.bf16.mxu1 %v2800_v28  ;;  %1966 = vmatprep.subr.bf16.mxu0 %v2881_v24  ;;  %v2941_v24 = vld [vmem:[%s3940_s5 + $0x48] sm:$0xff]  }
  0xc5   :  { %1967 = vmatpush1.bf16.msra.mxu0 %v2879_v36  ;;  %v2942_v36 = vld [vmem:[%s3940_s5 + $0x8] sm:$0xff]  }
  0xc6   :  { %1968 = vmatprep.subr.bf16.mxu0 %v2884_v37  ;;  %v2943_v37 = vld [vmem:[%s3940_s5 + $0x50] sm:$0xff]  }
  0xc7   :  { %1492 = vmatpush1.bf16.msra.mxu1 %v2798_v31  ;;  %v2896_v31 = vld [vmem:[%s3938_s3 + $0x114] ss:$8 sps:$4 sm:$0xff]  }
  0xc8   :  { %1493 = vmatprep.subr.bf16.mxu1 %v2803_v32  ;;  %v2939_v32 = vld [vmem:[%s3940_s5 + $0x40] sm:$0xff]  }
  0xc9   :  { %1969 = vmatpush1.bf16.msra.mxu0 %v2882_v22  ;;  %v2944_v22 = vld [vmem:[%s3940_s5 + $0x10] sm:$0xff]  }
  0xca   :  { %1970 = vmatprep.subr.bf16.mxu0 %v2887_v43  ;;  %v2947_v43 = vld [vmem:[%s3940_s5 + $0x60] sm:$0xff]  }
  0xcb   :  { %1494 = vmatpush1.bf16.msra.mxu1 %v2801_v0  ;;  %v2894_v0 = vld [vmem:[%s3938_s3 + $0x110] ss:$8 sps:$4 sm:$0xff]  }
  0xcc   :  { %1495 = vmatprep.subr.bf16.mxu1 %v2806_v35  ;;  %v2899_v35 = vld [vmem:[%s3938_s3 + $0x124] ss:$8 sps:$4 sm:$0xff]  }
  0xcd   :  { %1971 = vmatpush1.bf16.msra.mxu0 %v2885_v45  ;;  %v2908_v45 = vld [vmem:[%s3938_s3 + $0x154] ss:$8 sps:$4 sm:$0xff]  }
  0xce   :  { %1972 = vmatprep.subr.bf16.mxu0 %v2890_v48  ;;  %v2949_v48 = vld [vmem:[%s3940_s5 + $0x68] sm:$0xff]  }
  0xcf   :  { %1496 = vmatpush1.bf16.msra.mxu1 %v2804_v38  ;;  %v2897_v38 = vld [vmem:[%s3938_s3 + $0x120] ss:$8 sps:$4 sm:$0xff]  }
  0xd0   :  { %1497 = vmatprep.subr.bf16.mxu1 %v2809_v39  ;;  %v2902_v39 = vld [vmem:[%s3938_s3 + $0x134] ss:$8 sps:$4 sm:$0xff]  }
  0xd1   :  { %1973 = vmatpush1.bf16.msra.mxu0 %v2888_v50  ;;  %v2911_v50 = vld [vmem:[%s3938_s3 + $0x164] ss:$8 sps:$4 sm:$0xff]  }
  0xd2   :  { %1983 = vmatprep.subr.bf16.mxu0 %v2893_v55  ;;  %v2912_v55 = vld [vmem:[%s3938_s3 + $0x170] ss:$8 sps:$4 sm:$0xff]  }
  0xd3   :  { %1498 = vmatpush1.bf16.msra.mxu1 %v2807_v40  ;;  %v2945_v40 = vld [vmem:[%s3940_s5 + $0x58] sm:$0xff]  }
  0xd4   :  { %1499 = vmatprep.subr.bf16.mxu1 %v2812_v41  ;;  %v2900_v41 = vld [vmem:[%s3938_s3 + $0x130] ss:$8 sps:$4 sm:$0xff]  }
  0xd7   :  { %1500 = vmatpush1.bf16.msra.mxu1 %v2810_v7  ;;  %v2905_v7 = vld [vmem:[%s3938_s3 + $0x144] ss:$8 sps:$4 sm:$0xff]  }
  0xd8   :  { %1501 = vmatprep.subr.bf16.mxu1 %v2815_v42  ;;  %v2946_v42 = vld [vmem:[%s3940_s5 + $0x18] sm:$0xff]  }
  0xdb   :  { %1502 = vmatpush1.bf16.msra.mxu1 %v2813_v44  ;;  %v2903_v44 = vld [vmem:[%s3938_s3 + $0x140] ss:$8 sps:$4 sm:$0xff]  }
  0xdc   :  { %1503 = vmatprep.subr.bf16.mxu1 %v2818_v47  ;;  %v2948_v47 = vld [vmem:[%s3940_s5 + $0x20] sm:$0xff]  }
  0xdf   :  { %1504 = vmatpush1.bf16.msra.mxu1 %v2816_v49  ;;  %v2906_v49 = vld [vmem:[%s3938_s3 + $0x150] ss:$8 sps:$4 sm:$0xff]  }
  0xe0   :  { %1505 = vmatprep.subr.bf16.mxu1 %v2821_v51  ;;  %v2950_v51 = vld [vmem:[%s3940_s5 + $0x28] sm:$0xff]  }
  0xe3   :  { %1506 = vmatpush1.bf16.msra.mxu1 %v2819_v53  ;;  %v2909_v53 = vld [vmem:[%s3938_s3 + $0x160] ss:$8 sps:$4 sm:$0xff]  }
  0xe4   :  { %1507 = vmatprep.subr.bf16.mxu1 %v2824_v54  ;;  %v2914_v54 = vld [vmem:[%s3938_s3 + $0x174] ss:$8 sps:$4 sm:$0xff]  }
  0xe7   :  { %1508 = vmatpush1.bf16.msra.mxu1 %v2822_v56  ;;  %v2917_v56 = vld [vmem:[%s3938_s3 + $0x184] ss:$8 sps:$4 sm:$0xff]  }
  0xe8   :  { %1509 = vmatprep.subr.bf16.mxu1 %v2827_v57  ;;  %v2915_v57 = vld [vmem:[%s3938_s3 + $0x180] ss:$8 sps:$4 sm:$0xff]  }
  0xeb   :  { %1510 = vmatpush1.bf16.msra.mxu1 %v2825_v58  ;;  %v2920_v58 = vld [vmem:[%s3938_s3 + $0x194] ss:$8 sps:$4 sm:$0xff]  }
  0xec   :  { %1511 = vmatprep.subr.bf16.mxu1 %v2830_v59  ;;  %v2918_v59 = vld [vmem:[%s3938_s3 + $0x190] ss:$8 sps:$4 sm:$0xff]  }
  0xef   :  { %1512 = vmatpush1.bf16.msra.mxu1 %v2828_v60  ;;  %v2923_v60 = vld [vmem:[%s3938_s3 + $0x1a4] ss:$8 sps:$4 sm:$0xff]  }
  0xf0   :  { %1513 = vmatprep.subr.bf16.mxu1 %v2833_v61  ;;  %v2921_v61 = vld [vmem:[%s3938_s3 + $0x1a0] ss:$8 sps:$4 sm:$0xff]  }
  0xf3   :  { %1514 = vmatpush1.bf16.msra.mxu1 %v2831_v62  ;;  %v2926_v62 = vld [vmem:[%s3938_s3 + $0x1b4] ss:$8 sps:$4 sm:$0xff]  }
  0xf4   :  { %1515 = vmatprep.subr.bf16.mxu1 %v2836_v52  ;;  %v2924_v52 = vld [vmem:[%s3938_s3 + $0x1b0] ss:$8 sps:$4 sm:$0xff]  }
  0xf7   :  { %1516 = vmatpush1.bf16.msra.mxu1 %v2834_v63  ;;  %v2929_v63 = vld [vmem:[%s3938_s3 + $0x1c4] ss:$8 sps:$4 sm:$0xff]  }
  0xf8   :  { %1517 = vmatprep.subr.bf16.mxu1 %v2839_v1  ;;  %v2927_v1 = vld [vmem:[%s3938_s3 + $0x1c0] ss:$8 sps:$4 sm:$0xff]  }
  0xfb   :  { %1518 = vmatpush1.bf16.msra.mxu1 %v2837_v2  ;;  %v2932_v2 = vld [vmem:[%s3938_s3 + $0x1d4] ss:$8 sps:$4 sm:$0xff]  }
  0xfc   :  { %1519 = vmatprep.subr.bf16.mxu1 %v2842_v3  ;;  %v2930_v3 = vld [vmem:[%s3938_s3 + $0x1d0] ss:$8 sps:$4 sm:$0xff]  }
  0xff   :  { %1520 = vmatpush1.bf16.msra.mxu1 %v2840_v4  ;;  %v2935_v4 = vld [vmem:[%s3938_s3 + $0x1e4] ss:$8 sps:$4 sm:$0xff]  }
 0x100   :  { %2497 = vmatprep.subr.bf16.mxu1 %v2939_v32  ;;  %v1610_v32 = vld [vmem:[%s3939_s4] sm:$0x3] }
 0x102   :  { %1522 = vmatmul.mubr.bf16.vlgmr.msra.gmra.mrb[4].mxu1 %v3459_v34  ;;  %v311_v34 = vrot.slane %v3759_v11, %v310_v12 }
 0x103   :  { %2498 = vmatpush3.bf16.msra.mxu1 %v2940_v33  ;;  %v1615_v33 = vrot.slane %v1610_v32, %v306_v10 }
 0x104   :  { %2499 = vmatprep.subr.bf16.mxu1 %v2941_v24  ;;  %v1619_v24 = vrot.slane %v1610_v32, %v310_v12 }
 0x107   :  { %2500 = vmatpush3.bf16.msra.mxu1 %v2942_v36 }
 0x108   :  { %2501 = vmatprep.subr.bf16.mxu1 %v2943_v37 }
 0x10b   :  { %2502 = vmatpush3.bf16.msra.mxu1 %v2944_v22 }
 0x10c   :  { %2503 = vmatprep.subr.bf16.mxu1 %v2945_v40 }
 0x10f   :  { %2504 = vmatpush3.bf16.msra.mxu1 %v2946_v42 }
 0x110   :  { %2505 = vmatprep.subr.bf16.mxu1 %v2947_v43 }
 0x113   :  { %2506 = vmatpush3.bf16.msra.mxu1 %v2948_v47 }
 0x114   :  { %2507 = vmatprep.subr.bf16.mxu1 %v2949_v48 }
 0x115   :  { %v1318_v5 = vpop.f32.mrb[0].mxu1 }
 0x116   :  { %v1320_v6 = vpop.f32.mrb[1].mxu1  ;;  %v1319_v14 = vadd.f32 %v1318_v5, %v307_v13  ;;  %v2933_v5 = vld [vmem:[%s3938_s3 + $0x1e0] ss:$8 sps:$4 sm:$0xff]   ;;  %v318_v13 = vsub.s32 3, %v3149_v46 }
 0x117   :  { %v1322_v8 = vpop.f32.mrb[2].mxu1  ;;  %v1321_v15 = vadd.f32 %v1320_v6, %v311_v34  ;;  %2508 = vmatpush3.bf16.msra.mxu1 %v2950_v51  ;;  %v2938_v6 = vld [vmem:[%s3938_s3 + $0x1f4] ss:$8 sps:$4 sm:$0xff]  }
 0x118   :  { %v1323_v9 = vpop.f32.mrb[3].mxu1  ;;  %v2936_v8 = vld [vmem:[%s3938_s3 + $0x1f0] ss:$8 sps:$4 sm:$0xff]  }
 0x119   :  { %v314_v9 = vsub.s32 2, %v3149_v46  ;;  %v2480_v46 = vld [vmem:[%s3941_s6] ss:$0 sm:$0xff] }
 0x11b   :  { %v315_v34 = vrot.slane %v3759_v11, %v314_v9 }
 0x156   :  { %v1400_v16 = vpop.f32.mrb[0].mxu0 }
 0x157   :  { %v2520_v17 = vadd.f32 %v1400_v16, %v1319_v14  ;;  %v1402_v18 = vpop.f32.mrb[1].mxu0  ;;  %v319_v14 = vrot.slane %v3759_v11, %v318_v13  ;;  %v2951_v11 = vld [vmem:[%s3940_s5 + $0x70] sm:$0xff]  }
 0x158   :  { %v2522_v19 = vadd.f32 %v1402_v18, %v1321_v15  ;;  %v1404_v20 = vpop.f32.mrb[2].mxu0  ;;  %2509 = vmatprep.subr.bf16.mxu1 %v2951_v11 }
 0x159   :  { %vm1530_vm0 = vcmp.ge.f32.partialorder %v2520_v17, 0.0  ;;  %v1534_v21 = vmul.f32 0.01, %v2520_v17  ;;  %v1405_v23 = vpop.f32.mrb[3].mxu0 }
 0x15a   :  { %vm1531_vm1 = vcmp.ge.f32.partialorder %v2522_v19, 0.0  ;;  %v1535_v25 = vmul.f32 0.01, %v2522_v19 }
 0x15b   :  { %v1538_v26 = vsel %vm1530_vm0, %v2520_v17, %v1534_v21 }
 0x15c   :  { %v1539_v27 = vsel %vm1531_vm1, %v2522_v19, %v1535_v25  ;;  %v1542_v30 = vpack.c.bf16 %v1538_v26, %v1538_v26 }
 0x15d   :  { %v1543_v28 = vpack.c.bf16 %v1539_v27, %v1539_v27 }
 0x15f   :  { %1974 = vmatprep.mubr.bf16.mxu0 %v1543_v28 }
 0x160   :  { %1975 = vmatmul.mubr.bf16.vlgmr.msra.gmra.mrb[4].mxu0 %v1542_v30  ;;  %v2953_v30 = vld [vmem:[%s3940_s5 + $0x78] sm:$0xff]  }
 0x161   :  { %1984 = vmatpush1.bf16.msra.mxu0 %v2891_v29  ;;  %v2952_v29 = vld [vmem:[%s3940_s5 + $0x30] sm:$0xff]  }
 0x162   :  { %1985 = vmatprep.subr.bf16.mxu0 %v2896_v31  ;;  %2510 = vmatpush3.bf16.msra.mxu1 %v2952_v29  ;;  %v2954_v31 = vld [vmem:[%s3940_s5 + $0x38] sm:$0xff]  }
 0x163   :  { %2511 = vmatprep.subr.bf16.mxu1 %v2953_v30 }
 0x165   :  { %1986 = vmatpush1.bf16.msra.mxu0 %v2894_v0 }
 0x166   :  { %1987 = vmatprep.subr.bf16.mxu0 %v2899_v35  ;;  %2512 = vmatpush3.bf16.msra.mxu1 %v2954_v31 }
 0x169   :  { %1988 = vmatpush1.bf16.msra.mxu0 %v2897_v38 }
 0x16a   :  { %1989 = vmatprep.subr.bf16.mxu0 %v2902_v39 }
 0x16d   :  { %1990 = vmatpush1.bf16.msra.mxu0 %v2900_v41 }
 0x16e   :  { %1991 = vmatprep.subr.bf16.mxu0 %v2905_v7 }
 0x171   :  { %1992 = vmatpush1.bf16.msra.mxu0 %v2903_v44 }
 0x172   :  { %1993 = vmatprep.subr.bf16.mxu0 %v2908_v45 }
 0x175   :  { %1994 = vmatpush1.bf16.msra.mxu0 %v2906_v49 }
 0x176   :  { %1995 = vmatprep.subr.bf16.mxu0 %v2911_v50 }
 0x179   :  { %1996 = vmatpush1.bf16.msra.mxu0 %v2909_v53 }
 0x17a   :  { %1997 = vmatprep.subr.bf16.mxu0 %v2914_v54 }
 0x17d   :  { %1998 = vmatpush1.bf16.msra.mxu0 %v2912_v55 }
 0x17e   :  { %1999 = vmatprep.subr.bf16.mxu0 %v2917_v56 }
 0x181   :  { %2000 = vmatpush1.bf16.msra.mxu0 %v2915_v57 }
 0x182   :  { %2001 = vmatprep.subr.bf16.mxu0 %v2920_v58 }
 0x185   :  { %2002 = vmatpush1.bf16.msra.mxu0 %v2918_v59 }
 0x186   :  { %2003 = vmatprep.subr.bf16.mxu0 %v2923_v60 }
 0x189   :  { %2004 = vmatpush1.bf16.msra.mxu0 %v2921_v61 }
 0x18a   :  { %2005 = vmatprep.subr.bf16.mxu0 %v2926_v62 }
 0x18d   :  { %2006 = vmatpush1.bf16.msra.mxu0 %v2924_v52 }
 0x18e   :  { %2007 = vmatprep.subr.bf16.mxu0 %v2929_v63 }
 0x191   :  { %2008 = vmatpush1.bf16.msra.mxu0 %v2927_v1 }
 0x192   :  { %2009 = vmatprep.subr.bf16.mxu0 %v2932_v2 }
 0x195   :  { %2010 = vmatpush1.bf16.msra.mxu0 %v2930_v3 }
 0x196   :  { %2011 = vmatprep.subr.bf16.mxu0 %v2935_v4 }
 0x199   :  { %2012 = vmatpush1.bf16.msra.mxu0 %v2933_v5 }
 0x19a   :  { %2013 = vmatprep.subr.bf16.mxu0 %v2938_v6 }
 0x19d   :  { %2014 = vmatpush1.bf16.msra.mxu0 %v2936_v8 }
 0x1d5   :  { %v1523_v15 = vpop.f32.mrb[4].mxu1 }
 0x1d6   :  { %v2523_v16 = vadd.f32 %v1523_v15, %v315_v34  ;;  %v1525_v17 = vpop.f32.mrb[5].mxu1 }
 0x1d7   :  { %v2524_v18 = vadd.f32 %v1525_v17, %v319_v14  ;;  %v1527_v19 = vpop.f32.mrb[6].mxu1 }
 0x1d8   :  { %vm1532_vm2 = vcmp.ge.f32.partialorder %v2523_v16, 0.0  ;;  %v1536_v20 = vmul.f32 0.01, %v2523_v16  ;;  %v1528_v21 = vpop.f32.mrb[7].mxu1 }
 0x1d9   :  { %vm1533_vm3 = vcmp.ge.f32.partialorder %v2524_v18, 0.0  ;;  %v1537_v23 = vmul.f32 0.01, %v2524_v18 }
 0x1da   :  { %v1540_v25 = vsel %vm1532_vm2, %v2523_v16, %v1536_v20 }
 0x1db   :  { %v1541_v26 = vsel %vm1533_vm3, %v2524_v18, %v1537_v23  ;;  %v1544_v28 = vpack.c.bf16 %v1540_v25, %v1540_v25 }
 0x1dc   :  { %v1545_v27 = vpack.c.bf16 %v1541_v26, %v1541_v26 }
 0x1de   :  { %2015 = vmatprep.mubr.bf16.mxu0 %v1545_v27 }
 0x1df   :  { %2016 = vmatmul.mubr.bf16.vlgmr.msra.gmra.mrb[4].mxu0 %v1544_v28 }
 0x2b2   :  { %v2017_v0 = vpop.f32.mrb[4].mxu0 }
 0x2b3   :  { %v2525_v35 = vadd.f32 %v2017_v0, %v1615_v33  ;;  %v2019_v36 = vpop.f32.mrb[5].mxu0 }
 0x2b4   :  { %v2526_v37 = vadd.f32 %v2019_v36, %v1619_v24  ;;  %v2021_v38 = vpop.f32.mrb[6].mxu0 }
 0x2b5   :  { %vm2024_vm4 = vcmp.ge.f32.partialorder %v2525_v35, 0.0  ;;  %v2026_v39 = vmul.f32 0.01, %v2525_v35  ;;  %v2022_v22 = vpop.f32.mrb[7].mxu0 }
 0x2b6   :  { %vm2025_vm5 = vcmp.ge.f32.partialorder %v2526_v37, 0.0  ;;  %v2027_v40 = vmul.f32 0.01, %v2526_v37 }
 0x2b7   :  { %v2028_v41 = vsel %vm2024_vm4, %v2525_v35, %v2026_v39 }
 0x2b8   :  { %v2029_v7 = vsel %vm2025_vm5, %v2526_v37, %v2027_v40  ;;  %v2030_v43 = vpack.c.bf16 %v2028_v41, %v2028_v41 }
 0x2b9   :  { %v2031_v42 = vpack.c.bf16 %v2029_v7, %v2029_v7 }
 0x2bb   :  { %2199 = vmatprep.mubr.bf16.mxu1 %v2031_v42 }
 0x2bc   :  { %2200 = vmatmul.mubr.bf16.vlgmr.msra.gmra.mrb[8].mxu1 %v2030_v43 }
 0x38f   :  { %v2513_v10 = vpop.f32.mrb[8].mxu1 }
 0x390   :  { %v2514_v12 = vpop.f32.mrb[9].mxu1 }
 0x391   :  { %v2515_v44 = vadd.f32 %v2514_v12, %v2513_v10  ;;  %v2516_v45 = vpop.f32.mrb[10].mxu1 }
 0x392   :  { %v2517_v47 = vpop.f32.mrb[11].mxu1 }
 0x393   :  { %v2202_v48 = vadd.f32 %v2515_v44, %v2480_v46 }
 0x395   :  { %2207 = vst [vmem:[#allocation2] sm:$0xff] %v2202_v48 }
 0x396   :  { %2212 = vsyncadd [#allocation3], 96  ;;  %s2980_s8 = smov [#allocation2]  }
 0x397   :  { %s2213_s9 = sshll.u32 %s2980_s8, 4  ;;  %s2214_s9 = int_to_ptr.vmem [resolvable:$true] %s2213_s9 }
 0x398   :  { %s2955_s10 = scalar_lea.vmem %s2214_s9, 32  ;;  %s2959_s11 = scalar_lea.vmem %s2214_s9, 128 }
 0x399   :  { %p2956_p0 = scmp.ne.s32.totalorder %s2214_s9, %s2955_s10  ;;  %p2960_p1 = scmp.lt.s32.totalorder %s2214_s9, %s2214_s9 }
 0x39a   :  { %p2961_p2 = scmp.lt.s32.totalorder %s2959_s11, %s2955_s10 }
 0x39c   :  { %p2962_p3 = por %p2961_p2, %p2960_p1 }
 0x39e   :  { %p2963_p4 = pnand %p2962_p3, %p2956_p0 }
 0x3a0   :  { %2966 = shalt.err (!%p2963_p4)
}
 0x3a1   :  { %s2967_s13 = scalar_lea.hbm %s3942_s7, 32 }
 0x3a2   :  { %p2968_p5 = scmp.ne.s32.totalorder %s3942_s7, %s2967_s13  ;;  %p2971_p6 = scmp.lt.u32.totalorder %s2967_s13, %s3942_s7 }
 0x3a4   :  { %p2973_p7 = pnand %p2971_p6, %p2968_p5 }
 0x3a6   :  { %2976 = shalt.err (!%p2973_p7)
}
 0x3a7   :  { %s2981_s2 = smov 32   ;;  %s2982_s17 = smov 2  }
 0x3a8   :  { %2219 = dma.vmem_to_hbm [thread:$0]  %s2214_s9, 32, %s3942_s7, [#allocation3], %s2981_s2, %s2981_s2, %s2982_s17  }
 0x3a9   :  { %2977 = dma.done.wait [#allocation3], 128  }
 0x3aa   :  { %2978 = vsyncadd [#allocation3], 4294967168 }
 0x3ab   :  { %2223 = vsyncpa [#allocation3], 1 }

</bundles_post_ra>
